<compile_context>
chip_gen: v5e
topology: v5e:2x2
jax: 0.10.0
libtpu: 0.0.40
codegen_flags: <defaults>
</compile_context>

<pallas_src>
import math
import functools

import jax
import jax.numpy as jnp
from jax import lax
from jax.experimental import pallas as pl
from jax.experimental.pallas import tpu as pltpu


def make_pe_table(d_model: int, max_len: int = 5000) -> jnp.ndarray:
    """Builds the (max_len, d_model) sin/cos positional-encoding table (f32)."""
    position = jnp.arange(max_len, dtype=jnp.float32)[:, None]              # (L, 1)
    div_term = jnp.exp(
        jnp.arange(0, d_model, 2, dtype=jnp.float32) * (-math.log(10000.0) / d_model)
    )                                                                        # (D/2,)
    angles = position * div_term                                             # (L, D/2)
    pe = jnp.zeros((max_len, d_model), dtype=jnp.float32)
    pe = pe.at[:, 0::2].set(jnp.sin(angles))
    pe = pe.at[:, 1::2].set(jnp.cos(angles))
    return pe


def _pe_dropout_kernel(seed_ref, x_ref, pe_ref, o_ref, *, p, training):
    # seed_ref: (1,) int32 in SMEM (scalar prefetch)
    # x_ref/o_ref: (TS, B, D) block in VMEM; pe_ref: (TS, 1, D) block in VMEM.
    if training and p >= 1.0:
        # torch.nn.Dropout(p=1.0) zeroes everything.
        o_ref[...] = jnp.zeros(o_ref.shape, dtype=o_ref.dtype)
        return

    # Batch replication of pe is an implicit sublane-axis broadcast: cheap vreg
    # replication, no lane-axis data movement, no materialized (TS, B*D) temp.
    y = x_ref[...] + pe_ref[...]

    if training and p > 0.0:
        ts, b, d = o_ref.shape
        bd = b * d
        shape = (ts, b, d)

        # Scalar base (scalar core, essentially free): folds grid offset + seed.
        row0 = jnp.uint32(pl.program_id(0)) * jnp.uint32(ts)
        base = row0 * jnp.uint32(bd) + jnp.uint32(seed_ref[0]) * jnp.uint32(0x9E3779B9)

        # Global flat element index (u32, wraparound OK) -> tile-invariant mask.
        r = lax.broadcasted_iota(jnp.uint32, shape, 0) * jnp.uint32(bd)
        bi = lax.broadcasted_iota(jnp.uint32, shape, 1) * jnp.uint32(d)
        di = lax.broadcasted_iota(jnp.uint32, shape, 2)
        h = r + bi + di + base

        # Trimmed murmur-style finalizer: 2 multiplies + 2 xorshifts. Full-word
        # threshold compare is dominated by the (well-mixed) high bits.
        h = h * jnp.uint32(0x9E3779B1)
        h = h ^ (h >> 15)
        h = h * jnp.uint32(0x85EBCA6B)
        h = h ^ (h >> 13)

        # Keep with probability ~(1 - p); inverted-dropout scaling in y.dtype.
        threshold = jnp.uint32(min(int(p * 4294967296.0), 4294967295))
        keep = h >= threshold
        scale = jnp.asarray(1.0 / (1.0 - p), dtype=y.dtype)
        y = jnp.where(keep, y * scale, jnp.zeros_like(y))

    o_ref[...] = y.astype(o_ref.dtype)


def _choose_tile_rows(seq_len, batch, d_model, itemsize, target_bytes=2 << 20):
    """Rows per block so the padded x block is ~2 MiB, with >=8 grid steps when possible."""
    padded_b = -(-batch // 8) * 8
    padded_d = -(-d_model // 128) * 128
    slab_bytes = padded_b * padded_d * itemsize          # padded VMEM bytes per seq row
    ts = max(1, target_bytes // max(slab_bytes, 1))
    # Keep enough grid steps for dual-TC sharding / pipeline overlap on big inputs.
    ts = min(ts, seq_len, max(8, -(-seq_len // 8)))
    return int(ts)


def positional_encoding_forward(
    x: jnp.ndarray,
    pe_table: jnp.ndarray,
    *,
    p: float = 0.1,
    training: bool = True,
    seed: int = 0,
) -> jnp.ndarray:
    """x: (seq_len, batch, d_model). Returns dropout(x + pe[:seq_len])."""
    S, B, D = x.shape
    itemsize = x.dtype.itemsize

    # pe in x.dtype (bf16 math on bf16 inputs), shaped (S, 1, D) for broadcast.
    pe = pe_table[:S].astype(x.dtype).reshape(S, 1, D)

    TS = _choose_tile_rows(S, B, D, itemsize)
    grid = (pl.cdiv(S, TS),)

    # VMEM budget: double-buffered x-in / out / pe blocks (padded footprints)
    # plus in-kernel u32 index/hash/mask temporaries, with headroom; never
    # clamp to a full device VMEM (48 MiB cap is v7x-safe).
    padded_b = -(-B // 8) * 8
    padded_d = -(-D // 128) * 128
    x_blk = TS * padded_b * padded_d * itemsize
    pe_blk = TS * 8 * padded_d * itemsize
    temps = TS * padded_b * padded_d * 16
    vmem_limit = int(min(48 << 20,
                         max(16 << 20, 4 * x_blk + 2 * pe_blk + temps + (4 << 20))))

    n_elem = S * B * D
    kernel = functools.partial(_pe_dropout_kernel, p=float(p), training=bool(training))
    seed_arr = jnp.asarray([int(seed)], dtype=jnp.int32)   # runtime SMEM scalar

    out = pl.pallas_call(
        kernel,
        out_shape=jax.ShapeDtypeStruct((S, B, D), x.dtype),
        grid_spec=pltpu.PrefetchScalarGridSpec(
            num_scalar_prefetch=1,
            grid=grid,
            in_specs=[
                pl.BlockSpec((TS, B, D), lambda i, seed_ref: (i, 0, 0)),   # x
                pl.BlockSpec((TS, 1, D), lambda i, seed_ref: (i, 0, 0)),   # pe
            ],
            out_specs=pl.BlockSpec((TS, B, D), lambda i, seed_ref: (i, 0, 0)),
        ),
        compiler_params=pltpu.CompilerParams(
            dimension_semantics=("parallel",),
            vmem_limit_bytes=vmem_limit,
        ),
        cost_estimate=pl.CostEstimate(
            flops=n_elem * (3 if (training and 0.0 < p < 1.0) else 1),
            transcendentals=0,
            bytes_accessed=2 * n_elem * itemsize + S * D * itemsize,
        ),
    )(seed_arr, x, pe)

    return out


if __name__ == "__main__":
    # Small shapes implied by the forward: [seq_len, batch, d_model]
    S, B, D = 8, 2, 32
    key = jax.random.PRNGKey(0)
    x = jax.random.normal(key, (S, B, D), dtype=jnp.float32)

    pe_table = make_pe_table(D, max_len=5000)
    ref_eval = x + pe_table[:S][:, None, :]

    # 1) Deterministic path (eval mode / dropout off) vs. pure JAX reference.
    out_eval = positional_encoding_forward(x, pe_table, p=0.1, training=False)
    out_eval = jax.block_until_ready(out_eval)
    assert out_eval.shape == (S, B, D)
    assert jnp.allclose(out_eval, ref_eval, atol=1e-5, rtol=1e-5)

    # 2) Training path (inverted dropout, p=0.1, runtime seed).
    out_train = positional_encoding_forward(x, pe_table, p=0.1, training=True, seed=123)
    out_train = jax.block_until_ready(out_train)
    assert out_train.shape == (S, B, D)
    # Every surviving element equals (x + pe) / (1 - p); dropped elements are 0.
    scaled_ref = ref_eval / (1.0 - 0.1)
    match = jnp.isclose(out_train, scaled_ref, atol=1e-5) | (out_train == 0.0)
    assert bool(jnp.all(match))
    # Loose sanity check that the mask is neither all-keep nor all-drop.
    drop_frac = float(jnp.mean((out_train == 0.0).astype(jnp.float32)))
    assert 0.01 <= drop_frac <= 0.35, drop_frac

    # TODO(synk): dropout matches torch only in distribution, not bit-for-bit
    # (torch uses its own Philox RNG stream).
    print("KERNEL_OK")
</pallas_src>

<mosaic_0001>
module attributes {stable_mosaic.version = 11 : i64} {
  func.func @_pe_dropout_kernel(%arg0: i32, %arg1: memref<1xi32, #tpu.memory_space<smem>>, %arg2: memref<8x2x32xf32, #tpu.memory_space<vmem>>, %arg3: memref<8x1x32xf32, #tpu.memory_space<vmem>>, %arg4: memref<8x2x32xf32, #tpu.memory_space<vmem>>) attributes {dimension_semantics = [#tpu.dimension_semantics<parallel>], iteration_bounds = array<i64: 1>, scalar_prefetch = 1 : i64, scratch_operands = 0 : i64, tpu.core_type = #tpu.core_type<tc>, window_params = [{transform_indices = @transform_0, window_bounds = array<i64: 8, 2, 32>}, {transform_indices = @transform_1, window_bounds = array<i64: 8, 1, 32>}, {transform_indices = @transform_2, window_bounds = array<i64: 8, 2, 32>}]} {
    %c0 = arith.constant 0 : index
    %c0_0 = arith.constant 0 : index
    %c0_1 = arith.constant 0 : index
    %0 = vector.load %arg2[%c0, %c0_0, %c0_1] : memref<8x2x32xf32, #tpu.memory_space<vmem>>, vector<8x2x32xf32>
    %c0_2 = arith.constant 0 : index
    %c0_3 = arith.constant 0 : index
    %c0_4 = arith.constant 0 : index
    %1 = vector.load %arg3[%c0_2, %c0_3, %c0_4] : memref<8x1x32xf32, #tpu.memory_space<vmem>>, vector<8x1x32xf32>
    %2 = vector.broadcast %1 : vector<8x1x32xf32> to vector<8x2x32xf32>
    %3 = arith.addf %0, %2 : vector<8x2x32xf32>
    %c0_5 = arith.constant 0 : index
    %c0_6 = arith.constant 0 : index
    %c0_7 = arith.constant 0 : index
    %4 = vector.load %arg4[%c0_5, %c0_6, %c0_7] : memref<8x2x32xf32, #tpu.memory_space<vmem>>, vector<8x2x32xf32>
    tpu.vector_store %arg4[%c0_5, %c0_6, %c0_7], %3 {strides = array<i32>} : memref<8x2x32xf32, #tpu.memory_space<vmem>>, vector<8x2x32xf32>,
    return
  }
  func.func @transform_0(%arg0: i32, %arg1: memref<1xi32, #tpu.memory_space<smem>>) -> (i32, i32, i32) {
    %c0_i32 = arith.constant 0 : i32
    %c0_i32_0 = arith.constant 0 : i32
    %c0_i32_1 = arith.constant 0 : i32
    return %arg0, %c0_i32, %c0_i32_0 : i32, i32, i32
  }
  func.func @transform_1(%arg0: i32, %arg1: memref<1xi32, #tpu.memory_space<smem>>) -> (i32, i32, i32) {
    %c0_i32 = arith.constant 0 : i32
    %c0_i32_0 = arith.constant 0 : i32
    %c0_i32_1 = arith.constant 0 : i32
    return %arg0, %c0_i32, %c0_i32_0 : i32, i32, i32
  }
  func.func @transform_2(%arg0: i32, %arg1: memref<1xi32, #tpu.memory_space<smem>>) -> (i32, i32, i32) {
    %c0_i32 = arith.constant 0 : i32
    %c0_i32_0 = arith.constant 0 : i32
    %c0_i32_1 = arith.constant 0 : i32
    return %arg0, %c0_i32, %c0_i32_0 : i32, i32, i32
  }
}

</mosaic_0001>

<bundles_post_ra>
// kernel: tpu_custom_call.1
= control target key start
LH: loop header
LB: loop body
LE: loop exit
PB: predicated region body
PF: predicated region fallthrough
CT: control target
= control target key end

     0   :  { %9 = vsyncpa [#allocation5], 0  ;;  %s273_s0 = inlined_call_operand.<no memory space> [shape: s32[1], index: 0, kind: input, shape index: {}]   ;;  %s274_s1 = inlined_call_operand.hbm [shape: f32[8,2,32], index: 1, kind: input, shape index: {}]   ;;  %s275_s2 = inlined_call_operand.hbm [shape: f32[8,1,32], index: 2, kind: input, shape index: {}]   ;;  %s276_s3 = inlined_call_operand.hbm [shape: f32[8,2,32], index: 3, kind: output, shape index: {}]  }
   0x1   :  { %10 = vsyncpa [#allocation8], 0 }
   0x2   :  { %11 = vsyncpa [#allocation6], 0  ;;  %s16_s14 = sshll.u32 %s274_s1, 4  ;;  %s216_s15 = smov [#allocation4]   ;;  %s17_s14 = int_to_ptr.hbm [resolvable:$true] %s16_s14 }
   0x3   :  { %s18_s16 = sshll.u32 %s216_s15, 4  ;;  %s29_s18 = sshll.u32 %s275_s2, 4  ;;  %s19_s16 = int_to_ptr.vmem [resolvable:$true] %s18_s16  ;;  %s30_s18 = int_to_ptr.hbm [resolvable:$true] %s29_s18 }
   0x4   :  { %s217_s19 = smov 32   ;;  %s218_s20 = smov 2  }
   0x5   :  { %24 = dma.hbm_to_vmem [thread:$0]  %s17_s14, 256, %s19_s16, [#allocation5], %s217_s19, %s217_s19, %s218_s20  }
   0x6   :  { %s219_s21 = smov [#allocation7]   ;;  %s220_s23 = smov 16  }
   0x7   :  { %s31_s22 = sshll.u32 %s219_s21, 4  ;;  %s221_s1 = smov 1   ;;  %s32_s22 = int_to_ptr.vmem [resolvable:$true] %s31_s22 }
   0x8   :  { %37 = dma.hbm_to_vmem [thread:$0]  %s30_s18, 128, %s32_s22, [#allocation8], %s220_s23, %s220_s23, %s221_s1  }
   0x9   :  { %210 = dma.done.wait [#allocation5], 256  }
   0xa   :  { %211 = vsyncadd [#allocation5], 4294967040 }
   0xb   :  { %212 = dma.done.wait [#allocation8], 128  }
   0xc   :  { %213 = vsyncadd [#allocation8], 4294967168  ;;  %vm94_vm0 = vcmask 254976   ;;  %s222_s24 = smov [#allocation9]   ;;  %s109_s27 = sshll.u32 %s276_s3, 4  ;;  %s110_s27 = int_to_ptr.hbm [resolvable:$true] %s109_s27 }
   0xd   :  { %s252_s2 = sshll.u32 %s222_s24, 4  ;;  %v46_v0 = vld [vmem:[#allocation4] sm:$0x3]  ;;  %v130_v1 = vld [vmem:[#allocation7] ss:$0 sm:$0xff]  ;;  %s108_s2 = int_to_ptr.vmem [resolvable:$true] %s252_s2 }
   0xe   :  { %v47_v2 = vld [vmem:[#allocation4 + $0x2] sm:$0x3]  ;;  %v131_v3 = vld [vmem:[#allocation7 + $0x1] ss:$0 sm:$0xff]  ;;  %v86_v4 = vadd.f32 %v130_v1, %v46_v0  ;;  %v48_v5 = vld [vmem:[#allocation4 + $0x4] sm:$0x3] }
   0xf   :  { %v132_v6 = vld [vmem:[#allocation7 + $0x2] ss:$0 sm:$0xff]  ;;  %v87_v7 = vadd.f32 %v131_v3, %v47_v2  ;;  %v49_v8 = vld [vmem:[#allocation4 + $0x6] sm:$0x3]  ;;  %v133_v9 = vld [vmem:[#allocation7 + $0x3] ss:$0 sm:$0xff] }
  0x10   :  { %95 = vst.msk [vmem:[#allocation9] sm:$0x3] %vm94_vm0, %v86_v4  ;;  %v88_v10 = vadd.f32 %v132_v6, %v48_v5  ;;  %v50_v11 = vld [vmem:[#allocation4 + $0x8] sm:$0x3]  ;;  %v89_v12 = vadd.f32 %v133_v9, %v49_v8  ;;  %v134_v13 = vld [vmem:[#allocation7 + $0x4] ss:$0 sm:$0xff] }
  0x11   :  { %96 = vst.msk [vmem:[#allocation9 + $0x2] sm:$0x3] %vm94_vm0, %v87_v7  ;;  %v51_v14 = vld [vmem:[#allocation4 + $0xa] sm:$0x3]  ;;  %v135_v15 = vld [vmem:[#allocation7 + $0x5] ss:$0 sm:$0xff]  ;;  %v90_v16 = vadd.f32 %v134_v13, %v50_v11 }
  0x12   :  { %97 = vst.msk [vmem:[#allocation9 + $0x4] sm:$0x3] %vm94_vm0, %v88_v10  ;;  %v52_v17 = vld [vmem:[#allocation4 + $0xc] sm:$0x3]  ;;  %v91_v18 = vadd.f32 %v135_v15, %v51_v14  ;;  %v136_v19 = vld [vmem:[#allocation7 + $0x6] ss:$0 sm:$0xff] }
  0x13   :  { %98 = vst.msk [vmem:[#allocation9 + $0x6] sm:$0x3] %vm94_vm0, %v89_v12  ;;  %v53_v20 = vld [vmem:[#allocation4 + $0xe] sm:$0x3]  ;;  %v137_v21 = vld [vmem:[#allocation7 + $0x7] ss:$0 sm:$0xff]  ;;  %v92_v22 = vadd.f32 %v136_v19, %v52_v17 }
  0x14   :  { %99 = vst.msk [vmem:[#allocation9 + $0x8] sm:$0x3] %vm94_vm0, %v90_v16  ;;  %v93_v23 = vadd.f32 %v137_v21, %v53_v20 }
  0x15   :  { %100 = vst.msk [vmem:[#allocation9 + $0xa] sm:$0x3] %vm94_vm0, %v91_v18 }
  0x16   :  { %101 = vst.msk [vmem:[#allocation9 + $0xc] sm:$0x3] %vm94_vm0, %v92_v22 }
  0x17   :  { %102 = vst.msk [vmem:[#allocation9 + $0xe] sm:$0x3] %vm94_vm0, %v93_v23 }
  0x18   :  { %115 = dma.vmem_to_hbm [thread:$0]  %s108_s2, 256, %s110_s27, [#allocation6], %s217_s19, %s217_s19, %s218_s20  }
  0x19   :  { %214 = dma.done.wait [#allocation6], 256  }
  0x1a   :  { %215 = vsyncadd [#allocation6], 4294967040 }
  0x1b   :  { %120 = vsyncpa [#allocation5], 1 }
  0x1c   :  { %121 = vsyncpa [#allocation8], 1 }
  0x1d   :  { %122 = vsyncpa [#allocation6], 1 }

</bundles_post_ra>
